<compile_context>
chip_gen: v6e
topology: v6e:2x2x1
jax: 0.10.0
libtpu: 0.0.40
codegen_flags: <defaults>
</compile_context>

<pallas_src>
import jax
import jax.numpy as jnp
from jax.experimental import pallas as pl
from jax.experimental.pallas import tpu as pltpu

LANE = 128
SUBLANE = 16  # bf16 sublane packing


def _round_up(x, m):
    return ((x + m - 1) // m) * m


def _cdiv(a, b):
    return (a + b - 1) // b


def _pad2d(a, rows, cols):
    return jnp.pad(a, ((0, rows - a.shape[0]), (0, cols - a.shape[1])))


def _vmem_capacity_bytes():
    """Physical per-core VMEM (128 MiB on v5e/v6e, 64 MiB on v7x)."""
    try:
        return int(pltpu.get_tpu_info().vmem_capacity_bytes)
    except Exception:
        return 64 * 1024 * 1024  # conservative fallback (v7x)


# --------------------------------------------------------------------------- kernels

def _kernel_resident(x_ref, w1_ref, b1_ref, w2_ref, b2_ref, wh_ref, bh_ref, out_ref):
    """All weights VMEM-resident; one batch tile per grid step."""
    x = x_ref[...]

    h1 = jnp.dot(x, w1_ref[...], preferred_element_type=jnp.float32) + b1_ref[...]
    h1 = jnp.maximum(h1, 0.0).astype(x.dtype)

    h2 = jnp.dot(h1, w2_ref[...], preferred_element_type=jnp.float32) + b2_ref[...]
    h2 = jnp.maximum(h2, 0.0).astype(x.dtype)

    out_ref[...] = (jnp.dot(h2, wh_ref[...], preferred_element_type=jnp.float32)
                    + bh_ref[...]).astype(out_ref.dtype)


def _kernel_htiled(x_ref, w1_ref, b1_ref, w2_ref, b2_ref, wh_ref, bh_ref,
                   out_ref, acc_ref):
    """Hidden-dim tiled fallback: grid = (batch tiles, hidden tiles).

    Per hidden tile j: compute h1[:, j] = relu(x @ w1[:, j] + b1[j]) and accumulate
    h1[:, j] @ w2[j, :] into a (tb, h_pad) f32 scratch.  On the last j, apply bias +
    ReLU and run the fused policy/value head.
    """
    j = pl.program_id(1)

    @pl.when(j == 0)
    def _():
        acc_ref[...] = jnp.zeros_like(acc_ref)

    x = x_ref[...]
    h1 = jnp.dot(x, w1_ref[...], preferred_element_type=jnp.float32) + b1_ref[...]
    h1 = jnp.maximum(h1, 0.0).astype(x.dtype)
    acc_ref[...] += jnp.dot(h1, w2_ref[...], preferred_element_type=jnp.float32)

    @pl.when(j == pl.num_programs(1) - 1)
    def _():
        h2 = jnp.maximum(acc_ref[...] + b2_ref[...], 0.0).astype(x.dtype)
        out_ref[...] = (jnp.dot(h2, wh_ref[...], preferred_element_type=jnp.float32)
                        + bh_ref[...]).astype(out_ref.dtype)


# --------------------------------------------------------------------------- params

def init_params(key, input_dim, hidden_dim, action_dim):
    """nn.Linear-style init; weights stored [in, out], biases [1, out], f32."""
    ks = jax.random.split(key, 8)

    def linear(kw, kb, fan_in, fan_out):
        bound = 1.0 / jnp.sqrt(jnp.float32(fan_in))
        w = jax.random.uniform(kw, (fan_in, fan_out), jnp.float32, -bound, bound)
        b = jax.random.uniform(kb, (1, fan_out), jnp.float32, -bound, bound)
        return w, b

    w1, b1 = linear(ks[0], ks[1], input_dim, hidden_dim)    # base Linear 1
    w2, b2 = linear(ks[2], ks[3], hidden_dim, hidden_dim)   # base Linear 2
    wp, bp = linear(ks[4], ks[5], hidden_dim, action_dim)   # policy_head
    wv, bv = linear(ks[6], ks[7], hidden_dim, 1)            # value_head
    return (w1, b1, w2, b2, wp, bp, wv, bv)


def prepare_params(params, compute_dtype=jnp.bfloat16):
    """Pad to 128-lane multiples, fuse policy/value heads, cast weights to bf16."""
    w1, b1, w2, b2, wp, bp, wv, bv = params
    input_dim, hidden_dim = w1.shape
    action_dim = wp.shape[1]

    d_pad = _round_up(input_dim, LANE)
    h_pad = _round_up(hidden_dim, LANE)
    o_pad = _round_up(action_dim + 1, LANE)

    wh = jnp.concatenate([wp, wv], axis=1)   # [hidden, action_dim + 1]
    bh = jnp.concatenate([bp, bv], axis=1)

    return dict(
        w1=_pad2d(w1, d_pad, h_pad).astype(compute_dtype),
        b1=_pad2d(b1, 1, h_pad).astype(jnp.float32),
        w2=_pad2d(w2, h_pad, h_pad).astype(compute_dtype),
        b2=_pad2d(b2, 1, h_pad).astype(jnp.float32),
        wh=_pad2d(wh, h_pad, o_pad).astype(compute_dtype),
        bh=_pad2d(bh, 1, o_pad).astype(jnp.float32),
        input_dim=input_dim, hidden_dim=hidden_dim, action_dim=action_dim,
        d_pad=d_pad, h_pad=h_pad, o_pad=o_pad, compute_dtype=compute_dtype,
    )


# --------------------------------------------------------------------------- forward

def actor_critic_forward(x, prepped, block_batch=512, force_htiled=False,
                         out_dtype=None):
    """Mirrors ActorCriticNet.forward.

    x: [batch, input_dim] or higher rank (flattened to [batch, -1]).
    Returns (policy_logits [batch, action_dim] f32, value [batch, 1] f32).
    """
    if x.ndim > 2:
        x = x.reshape(x.shape[0], -1)
    batch, input_dim = x.shape
    assert input_dim == prepped["input_dim"]

    cdtype = prepped["compute_dtype"]
    csize = jnp.dtype(cdtype).itemsize
    d_pad, h_pad, o_pad = prepped["d_pad"], prepped["h_pad"], prepped["o_pad"]
    action_dim = prepped["action_dim"]
    # bf16 output slab (f32 accumulation inside the kernel, single rounding at the
    # store). Pass out_dtype=jnp.float32 if the value head feeds high-precision targets.
    out_dtype = cdtype if out_dtype is None else out_dtype
    osize = jnp.dtype(out_dtype).itemsize

    # ---- per-generation VMEM budget (v5e/v6e ~108 MiB, v7x ~52 MiB) ----
    vmem_cap = _vmem_capacity_bytes()
    budget = max(16 * 1024 * 1024,
                 min(int(0.85 * vmem_cap), vmem_cap - 12 * 1024 * 1024))

    # ---- batch tile: large tiles, but >= 2 grid steps when batch allows so the
    # "parallel" axis shards across both TensorCores on v7x ----
    tb = min(block_batch, _round_up(batch, SUBLANE))
    if _cdiv(batch, tb) < 2 and batch > SUBLANE:
        tb = _round_up(_cdiv(batch, 2), SUBLANE)

    w_bytes = (d_pad * h_pad + h_pad * h_pad + h_pad * o_pad) * csize
    b_bytes = (2 * h_pad + o_pad) * 4

    def resident_vmem(tb_):
        return (w_bytes + b_bytes                 # single-buffered resident weights
                + 2 * tb_ * d_pad * csize         # double-buffered x tiles
                + 2 * tb_ * o_pad * osize         # double-buffered out tiles
                + 3 * tb_ * h_pad * 4)            # f32 intermediates headroom

    use_htiled = force_htiled
    if not use_htiled and resident_vmem(tb) > budget:
        tb_try = tb
        while tb_try > 128 and resident_vmem(tb_try) > budget:
            tb_try = max(128, _round_up(tb_try // 2, SUBLANE))
        if resident_vmem(tb_try) <= budget:
            tb = tb_try
        else:
            use_htiled = True

    th = LANE
    if use_htiled:
        def htiled_vmem(tb_, th_):
            return (2 * d_pad * th_ * csize       # w1 column blocks (double-buffered)
                    + 2 * th_ * h_pad * csize     # w2 row blocks (double-buffered)
                    + 2 * th_ * 4                 # b1 blocks
                    + h_pad * 4 + o_pad * 4       # resident b2 / bh
                    + h_pad * o_pad * csize       # resident fused head weight
                    + 2 * tb_ * d_pad * csize     # x tiles
                    + 2 * tb_ * o_pad * osize     # out tiles
                    + tb_ * h_pad * 4             # f32 accumulator scratch
                    + 2 * tb_ * th_ * 4           # h1 intermediates
                    + tb_ * h_pad * csize)        # h2 on final step

        for cand in (512, 256):
            if h_pad % cand == 0 and htiled_vmem(tb, cand) <= budget:
                th = cand
                break
        while tb > SUBLANE and htiled_vmem(tb, th) > budget:
            tb = max(SUBLANE, _round_up(tb // 2, SUBLANE))

    batch_pad = _round_up(batch, tb)
    n_b = batch_pad // tb

    # ---- pad x in the compute dtype; skip entirely when already aligned ----
    x_c = x.astype(cdtype)
    if batch_pad != batch or d_pad != input_dim:
        x_c = _pad2d(x_c, batch_pad, d_pad)

    flops = 2 * batch_pad * (d_pad * h_pad + h_pad * h_pad + h_pad * o_pad)
    bytes_accessed = (batch_pad * d_pad * csize + batch_pad * o_pad * osize
                      + w_bytes + b_bytes)
    cost = pl.CostEstimate(flops=flops, transcendentals=0,
                           bytes_accessed=bytes_accessed)

    if not use_htiled:
        # Grid-invariant weights/biases: single-buffered, VMEM-resident.
        def resident_spec(shape):
            return pl.BlockSpec(shape, lambda i: (0, 0),
                                pipeline_mode=pl.Buffered(1))

        out = pl.pallas_call(
            _kernel_resident,
            out_shape=jax.ShapeDtypeStruct((batch_pad, o_pad), out_dtype),
            grid=(n_b,),
            in_specs=[
                pl.BlockSpec((tb, d_pad), lambda i: (i, 0)),   # x: streamed per tile
                resident_spec((d_pad, h_pad)),                 # w1
                resident_spec((1, h_pad)),                     # b1
                resident_spec((h_pad, h_pad)),                 # w2
                resident_spec((1, h_pad)),                     # b2
                resident_spec((h_pad, o_pad)),                 # fused head weight
                resident_spec((1, o_pad)),                     # fused head bias
            ],
            out_specs=pl.BlockSpec((tb, o_pad), lambda i: (i, 0)),
            compiler_params=pltpu.CompilerParams(
                dimension_semantics=("parallel",),
                vmem_limit_bytes=int(budget)),
            cost_estimate=cost,
        )(x_c, prepped["w1"], prepped["b1"], prepped["w2"], prepped["b2"],
          prepped["wh"], prepped["bh"])
    else:
        n_h = h_pad // th

        def resident_spec2(shape):
            return pl.BlockSpec(shape, lambda i, j: (0, 0),
                                pipeline_mode=pl.Buffered(1))

        out = pl.pallas_call(
            _kernel_htiled,
            out_shape=jax.ShapeDtypeStruct((batch_pad, o_pad), out_dtype),
            grid=(n_b, n_h),
            in_specs=[
                pl.BlockSpec((tb, d_pad), lambda i, j: (i, 0)),   # x: resident per i
                pl.BlockSpec((d_pad, th), lambda i, j: (0, j)),   # w1 column block
                pl.BlockSpec((1, th), lambda i, j: (0, j)),       # b1 block
                pl.BlockSpec((th, h_pad), lambda i, j: (j, 0)),   # w2 row block
                resident_spec2((1, h_pad)),                       # b2
                resident_spec2((h_pad, o_pad)),                   # fused head weight
                resident_spec2((1, o_pad)),                       # fused head bias
            ],
            out_specs=pl.BlockSpec((tb, o_pad), lambda i, j: (i, 0)),
            scratch_shapes=[pltpu.VMEM((tb, h_pad), jnp.float32)],
            compiler_params=pltpu.CompilerParams(
                dimension_semantics=("parallel", "arbitrary"),
                vmem_limit_bytes=int(budget)),
            cost_estimate=cost,
        )(x_c, prepped["w1"], prepped["b1"], prepped["w2"], prepped["b2"],
          prepped["wh"], prepped["bh"])

    logits = out[:batch, :action_dim].astype(jnp.float32)
    value = out[:batch, action_dim:action_dim + 1].astype(jnp.float32)
    return logits, value


# --------------------------------------------------------------------------- main

if __name__ == "__main__":
    key = jax.random.PRNGKey(0)
    k_x, k_p, k_x2, k_p2 = jax.random.split(key, 4)

    def reference(x, params):
        w1, b1, w2, b2, wp, bp, wv, bv = params
        xf = x.reshape(x.shape[0], -1)
        h1 = jnp.maximum(xf @ w1 + b1, 0.0)
        h2 = jnp.maximum(h1 @ w2 + b2, 0.0)
        return h2 @ wp + bp, h2 @ wv + bv

    # --- Test 1: tiny shapes (single grid point, fully VMEM-resident path) ---
    batch, c, h, w = 2, 4, 4, 4            # -> input_dim = 64
    input_dim, hidden_dim, action_dim = c * h * w, 32, 4
    x = jax.random.normal(k_x, (batch, c, h, w), jnp.float32)
    params = init_params(k_p, input_dim, hidden_dim, action_dim)
    prepped = prepare_params(params, compute_dtype=jnp.bfloat16)

    logits, value = actor_critic_forward(x, prepped)
    jax.block_until_ready((logits, value))

    ref_logits, ref_value = reference(x, params)
    assert logits.shape == (batch, action_dim)
    assert value.shape == (batch, 1)
    # bf16 weights/activations/output with f32 accumulation vs f32 reference.
    assert jnp.allclose(logits, ref_logits, atol=3e-2, rtol=3e-2)
    assert jnp.allclose(value, ref_value, atol=3e-2, rtol=3e-2)

    # --- Test 2: exercise the hidden-tiled fallback + multi-tile batch grid ---
    batch2, input_dim2, hidden_dim2, action_dim2 = 40, 64, 384, 6
    x2 = jax.random.normal(k_x2, (batch2, input_dim2), jnp.float32)
    params2 = init_params(k_p2, input_dim2, hidden_dim2, action_dim2)
    prepped2 = prepare_params(params2, compute_dtype=jnp.bfloat16)

    logits2, value2 = actor_critic_forward(x2, prepped2, force_htiled=True)
    jax.block_until_ready((logits2, value2))

    ref_logits2, ref_value2 = reference(x2, params2)
    assert logits2.shape == (batch2, action_dim2)
    assert value2.shape == (batch2, 1)
    assert jnp.allclose(logits2, ref_logits2, atol=5e-2, rtol=5e-2)
    assert jnp.allclose(value2, ref_value2, atol=5e-2, rtol=5e-2)

    # TODO(synk): act()/save_model()/load_model() are host-side utilities (argmax,
    # checkpoint I/O) and are intentionally not part of the kernel.
    # TODO(synk): optional v7x-only fp8 storage of w2 (halves resident VMEM, doubles
    # MXU peak) is not implemented; gate by generation if added.

    print("KERNEL_OK")
</pallas_src>

<mosaic_0001>
module attributes {stable_mosaic.version = 11 : i64} {
  func.func @_kernel_resident(%arg0: i32, %arg1: memref<16x128xbf16, #tpu.memory_space<vmem>>, %arg2: memref<128x128xbf16, #tpu.memory_space<vmem>>, %arg3: memref<1x128xf32, #tpu.memory_space<vmem>>, %arg4: memref<128x128xbf16, #tpu.memory_space<vmem>>, %arg5: memref<1x128xf32, #tpu.memory_space<vmem>>, %arg6: memref<128x128xbf16, #tpu.memory_space<vmem>>, %arg7: memref<1x128xf32, #tpu.memory_space<vmem>>, %arg8: memref<16x128xbf16, #tpu.memory_space<vmem>>) attributes {dimension_semantics = [#tpu.dimension_semantics<parallel>], iteration_bounds = array<i64: 1>, scalar_prefetch = 0 : i64, scratch_operands = 0 : i64, tpu.core_type = #tpu.core_type<tc>, window_params = [{transform_indices = @transform_0, window_bounds = array<i64: 16, 128>}, {pipeline_mode = #tpu.pipeline_mode<synchronous>, transform_indices = @transform_1, window_bounds = array<i64: 128, 128>}, {pipeline_mode = #tpu.pipeline_mode<synchronous>, transform_indices = @transform_2, window_bounds = array<i64: 1, 128>}, {pipeline_mode = #tpu.pipeline_mode<synchronous>, transform_indices = @transform_3, window_bounds = array<i64: 128, 128>}, {pipeline_mode = #tpu.pipeline_mode<synchronous>, transform_indices = @transform_4, window_bounds = array<i64: 1, 128>}, {pipeline_mode = #tpu.pipeline_mode<synchronous>, transform_indices = @transform_5, window_bounds = array<i64: 128, 128>}, {pipeline_mode = #tpu.pipeline_mode<synchronous>, transform_indices = @transform_6, window_bounds = array<i64: 1, 128>}, {transform_indices = @transform_7, window_bounds = array<i64: 16, 128>}]} {
    %c0 = arith.constant 0 : index
    %c0_0 = arith.constant 0 : index
    %0 = vector.load %arg1[%c0, %c0_0] : memref<16x128xbf16, #tpu.memory_space<vmem>>, vector<16x128xbf16>
    %c0_1 = arith.constant 0 : index
    %c0_2 = arith.constant 0 : index
    %1 = vector.load %arg2[%c0_1, %c0_2] : memref<128x128xbf16, #tpu.memory_space<vmem>>, vector<128x128xbf16>
    %cst = arith.constant dense<0.000000e+00> : vector<16x128xf32>
    %2 = tpu.matmul %0, %1, %cst {dimension_numbers = #tpu.dot_dimension_numbers<[1], [0], [0], [1], [0, 0, 1, 1], [], []>} : vector<16x128xbf16>, vector<128x128xbf16>, vector<16x128xf32> -> vector<16x128xf32>
    %c0_3 = arith.constant 0 : index
    %c0_4 = arith.constant 0 : index
    %3 = vector.load %arg3[%c0_3, %c0_4] : memref<1x128xf32, #tpu.memory_space<vmem>>, vector<1x128xf32>
    %4 = vector.broadcast %3 : vector<1x128xf32> to vector<16x128xf32>
    %5 = arith.addf %2, %4 : vector<16x128xf32>
    %cst_5 = arith.constant 0.000000e+00 : f32
    %6 = vector.broadcast %cst_5 : f32 to vector<16x128xf32>
    %7 = arith.maximumf %5, %6 : vector<16x128xf32>
    %8 = arith.truncf %7 : vector<16x128xf32> to vector<16x128xbf16>
    %c0_6 = arith.constant 0 : index
    %c0_7 = arith.constant 0 : index
    %9 = vector.load %arg4[%c0_6, %c0_7] : memref<128x128xbf16, #tpu.memory_space<vmem>>, vector<128x128xbf16>
    %cst_8 = arith.constant dense<0.000000e+00> : vector<16x128xf32>
    %10 = tpu.matmul %8, %9, %cst_8 {dimension_numbers = #tpu.dot_dimension_numbers<[1], [0], [0], [1], [0, 0, 1, 1], [], []>} : vector<16x128xbf16>, vector<128x128xbf16>, vector<16x128xf32> -> vector<16x128xf32>
    %c0_9 = arith.constant 0 : index
    %c0_10 = arith.constant 0 : index
    %11 = vector.load %arg5[%c0_9, %c0_10] : memref<1x128xf32, #tpu.memory_space<vmem>>, vector<1x128xf32>
    %12 = vector.broadcast %11 : vector<1x128xf32> to vector<16x128xf32>
    %13 = arith.addf %10, %12 : vector<16x128xf32>
    %cst_11 = arith.constant 0.000000e+00 : f32
    %14 = vector.broadcast %cst_11 : f32 to vector<16x128xf32>
    %15 = arith.maximumf %13, %14 : vector<16x128xf32>
    %16 = arith.truncf %15 : vector<16x128xf32> to vector<16x128xbf16>
    %c0_12 = arith.constant 0 : index
    %c0_13 = arith.constant 0 : index
    %17 = vector.load %arg6[%c0_12, %c0_13] : memref<128x128xbf16, #tpu.memory_space<vmem>>, vector<128x128xbf16>
    %cst_14 = arith.constant dense<0.000000e+00> : vector<16x128xf32>
    %18 = tpu.matmul %16, %17, %cst_14 {dimension_numbers = #tpu.dot_dimension_numbers<[1], [0], [0], [1], [0, 0, 1, 1], [], []>} : vector<16x128xbf16>, vector<128x128xbf16>, vector<16x128xf32> -> vector<16x128xf32>
    %c0_15 = arith.constant 0 : index
    %c0_16 = arith.constant 0 : index
    %19 = vector.load %arg7[%c0_15, %c0_16] : memref<1x128xf32, #tpu.memory_space<vmem>>, vector<1x128xf32>
    %20 = vector.broadcast %19 : vector<1x128xf32> to vector<16x128xf32>
    %21 = arith.addf %18, %20 : vector<16x128xf32>
    %22 = arith.truncf %21 : vector<16x128xf32> to vector<16x128xbf16>
    %c0_17 = arith.constant 0 : index
    %c0_18 = arith.constant 0 : index
    %23 = vector.load %arg8[%c0_17, %c0_18] : memref<16x128xbf16, #tpu.memory_space<vmem>>, vector<16x128xbf16>
    tpu.vector_store %arg8[%c0_17, %c0_18], %22 {strides = array<i32>} : memref<16x128xbf16, #tpu.memory_space<vmem>>, vector<16x128xbf16>,
    return
  }
  func.func @transform_0(%arg0: i32) -> (i32, i32) {
    %c0_i32 = arith.constant 0 : i32
    %c0_i32_0 = arith.constant 0 : i32
    return %arg0, %c0_i32 : i32, i32
  }
  func.func @transform_1(%arg0: i32) -> (i32, i32) {
    %c0_i32 = arith.constant 0 : i32
    %c0_i32_0 = arith.constant 0 : i32
    %c0_i32_1 = arith.constant 0 : i32
    return %c0_i32, %c0_i32_0 : i32, i32
  }
  func.func @transform_2(%arg0: i32) -> (i32, i32) {
    %c0_i32 = arith.constant 0 : i32
    %c0_i32_0 = arith.constant 0 : i32
    %c0_i32_1 = arith.constant 0 : i32
    return %c0_i32, %c0_i32_0 : i32, i32
  }
  func.func @transform_3(%arg0: i32) -> (i32, i32) {
    %c0_i32 = arith.constant 0 : i32
    %c0_i32_0 = arith.constant 0 : i32
    %c0_i32_1 = arith.constant 0 : i32
    return %c0_i32, %c0_i32_0 : i32, i32
  }
  func.func @transform_4(%arg0: i32) -> (i32, i32) {
    %c0_i32 = arith.constant 0 : i32
    %c0_i32_0 = arith.constant 0 : i32
    %c0_i32_1 = arith.constant 0 : i32
    return %c0_i32, %c0_i32_0 : i32, i32
  }
  func.func @transform_5(%arg0: i32) -> (i32, i32) {
    %c0_i32 = arith.constant 0 : i32
    %c0_i32_0 = arith.constant 0 : i32
    %c0_i32_1 = arith.constant 0 : i32
    return %c0_i32, %c0_i32_0 : i32, i32
  }
  func.func @transform_6(%arg0: i32) -> (i32, i32) {
    %c0_i32 = arith.constant 0 : i32
    %c0_i32_0 = arith.constant 0 : i32
    %c0_i32_1 = arith.constant 0 : i32
    return %c0_i32, %c0_i32_0 : i32, i32
  }
  func.func @transform_7(%arg0: i32) -> (i32, i32) {
    %c0_i32 = arith.constant 0 : i32
    %c0_i32_0 = arith.constant 0 : i32
    return %arg0, %c0_i32 : i32, i32
  }
}

</mosaic_0001>

<bundles_post_ra>
// kernel: tpu_custom_call.1
= control target key start
LH: loop header
LB: loop body
LE: loop exit
PB: predicated region body
PF: predicated region fallthrough
CT: control target
= control target key end

     0   :  { %12 = vsyncpa [#allocation3], 0  ;;  %s846_s0 = inlined_call_operand.hbm [shape: bf16[16,128], index: 0, kind: input, shape index: {}]   ;;  %s847_s1 = inlined_call_operand.hbm [shape: bf16[128,128], index: 1, kind: input, shape index: {}]   ;;  %s848_s2 = inlined_call_operand.vmem [shape: f32[1,128], index: 2, kind: input, shape index: {}]   ;;  %s849_s3 = inlined_call_operand.hbm [shape: bf16[128,128], index: 3, kind: input, shape index: {}]   ;;  %s850_s4 = inlined_call_operand.vmem [shape: f32[1,128], index: 4, kind: input, shape index: {}]   ;;  %s851_s5 = inlined_call_operand.hbm [shape: bf16[128,128], index: 5, kind: input, shape index: {}]   ;;  %s852_s6 = inlined_call_operand.vmem [shape: f32[1,128], index: 6, kind: input, shape index: {}]   ;;  %s853_s7 = inlined_call_operand.hbm [shape: bf16[16,128], index: 7, kind: output, shape index: {}]  }
   0x1   :  { %13 = vsyncpa [#allocation6], 0 }
   0x2   :  { %14 = vsyncpa [#allocation9], 0 }
   0x3   :  { %15 = vsyncpa [#allocation4], 0  ;;  %s728_s24 = smov [#allocation5]   ;;  %s729_s26 = smov [#allocation2]  }
   0x4   :  { %s33_s25 = sshll.u32 %s728_s24, 4  ;;  %s21_s27 = sshll.u32 %s729_s26, 4  ;;  %s34_s25 = int_to_ptr.vmem [resolvable:$true] %s33_s25  ;;  %s22_s27 = int_to_ptr.vmem [resolvable:$true] %s21_s27 }
   0x5   :  { %s628_s28 = scalar_lea.vmem %s34_s25, 1024  ;;  %p633_p1 = scmp.lt.s32.totalorder %s34_s25, %s34_s25 }
   0x6   :  { %p629_p0 = scmp.ne.s32.totalorder %s34_s25, %s628_s28  ;;  %p634_p2 = scmp.lt.s32.totalorder %s628_s28, %s628_s28 }
   0x8   :  { %p635_p3 = por %p634_p2, %p633_p1 }
   0xa   :  { %p636_p4 = pnand %p635_p3, %p629_p0 }
   0xc   :  { %639 = shalt.err (!%p636_p4)
}
   0xd   :  { %s730_s29 = smov 64   ;;  %s731_s30 = smov 4  }
   0xe   :  { %39 = dma.hbm_to_vmem [thread:$0]  %s847_s1, 1024, %s34_s25, [#allocation6], %s730_s29, %s730_s29, %s731_s30  }
   0xf   :  { %s648_s10 = scalar_lea.vmem %s22_s27, 128  ;;  %p653_p6 = scmp.lt.s32.totalorder %s22_s27, %s22_s27 }
  0x10   :  { %p649_p5 = scmp.ne.s32.totalorder %s22_s27, %s648_s10  ;;  %p654_p7 = scmp.lt.s32.totalorder %s648_s10, %s648_s10 }
  0x12   :  { %p655_p8 = por %p654_p7, %p653_p6 }
  0x14   :  { %p656_p9 = pnand %p655_p8, %p649_p5 }
  0x16   :  { %659 = shalt.err (!%p656_p9)
}
  0x17   :  { %27 = dma.hbm_to_vmem [thread:$0]  %s846_s0, 128, %s22_s27, [#allocation3], %s730_s29, %s730_s29, %s731_s30  }
  0x18   :  { %s732_s13 = smov [#allocation7]   ;;  %s733_s15 = smov [#allocation8]  }
  0x19   :  { %s47_s14 = sshll.u32 %s732_s13, 4  ;;  %s61_s16 = sshll.u32 %s733_s15, 4  ;;  %s48_s14 = int_to_ptr.vmem [resolvable:$true] %s47_s14  ;;  %s62_s16 = int_to_ptr.vmem [resolvable:$true] %s61_s16 }
  0x1a   :  { %s668_s1 = scalar_lea.vmem %s48_s14, 1024  ;;  %p673_p11 = scmp.lt.s32.totalorder %s48_s14, %s48_s14 }
  0x1b   :  { %p669_p10 = scmp.ne.s32.totalorder %s48_s14, %s668_s1  ;;  %p674_p12 = scmp.lt.s32.totalorder %s668_s1, %s668_s1 }
  0x1d   :  { %p675_p13 = por %p674_p12, %p673_p11 }
  0x1f   :  { %p676_p0 = pnand %p675_p13, %p669_p10 }
  0x21   :  { %679 = shalt.err (!%p676_p0)
}
  0x22   :  { %53 = dma.hbm_to_vmem [thread:$0]  %s849_s3, 1024, %s48_s14, [#allocation6], %s730_s29, %s730_s29, %s731_s30  }
  0x23   :  { %s688_s0 = scalar_lea.vmem %s62_s16, 1024  ;;  %p693_p2 = scmp.lt.s32.totalorder %s62_s16, %s62_s16 }
  0x24   :  { %p689_p1 = scmp.ne.s32.totalorder %s62_s16, %s688_s0  ;;  %p694_p3 = scmp.lt.s32.totalorder %s688_s0, %s688_s0 }
  0x26   :  { %p695_p4 = por %p694_p3, %p693_p2 }
  0x28   :  { %p696_p5 = pnand %p695_p4, %p689_p1 }
  0x2a   :  { %699 = shalt.err (!%p696_p5)
}
  0x2b   :  { %67 = dma.hbm_to_vmem [thread:$0]  %s851_s5, 1024, %s62_s16, [#allocation9], %s730_s29, %s730_s29, %s731_s30  }
  0x2c   :  { %720 = dma.done.wait [#allocation3], 128  }
  0x2d   :  { %721 = vsyncadd [#allocation3], 4294967168 }
  0x2e   :  { %722 = dma.done.wait [#allocation6], 2048  }
  0x2f   :  { %723 = vsyncadd [#allocation6], 4294965248 }
  0x30   :  { %724 = dma.done.wait [#allocation9], 1024  }
  0x31   :  { %725 = vsyncadd [#allocation9], 4294966272  ;;  %v734_v0 = vmov 0.0   ;;  %vm735_vm0 = vmmov 0   ;;  %v595_v1 = vld [vmem:[#allocation5 + $0x38] sm:$0xff]   ;;  %v596_v2 = vld [vmem:[#allocation5 + $0x30] sm:$0xff]  }
  0x32   :  { %526 = vmatprep.subr.bf16.mxu0 %v734_v0  ;;  %542 = vmatprep.mubr.msk.bf16.mxu0 %vm735_vm0, %v734_v0  ;;  %v597_v3 = vld [vmem:[#allocation5 + $0x28] sm:$0xff]   ;;  %v604_v4 = vld [vmem:[#allocation7 + $0x38] sm:$0xff]   ;;  %v598_v5 = vld [vmem:[#allocation5 + $0x20] sm:$0xff]   ;;  %s736_s24 = smov [#allocation10]  }
  0x33   :  { %546 = vmatprep.subr.bf16.mxu1 %v734_v0  ;;  %562 = vmatprep.mubr.msk.bf16.mxu1 %vm735_vm0, %v734_v0  ;;  %v605_v6 = vld [vmem:[#allocation7 + $0x30] sm:$0xff]   ;;  %v599_v7 = vld [vmem:[#allocation5 + $0x18] sm:$0xff]   ;;  %v606_v8 = vld [vmem:[#allocation7 + $0x28] sm:$0xff]   ;;  %s448_s25 = sshll.u32 %s736_s24, 4  ;;  %s449_s25 = int_to_ptr.vmem [resolvable:$true] %s448_s25 }
  0x34   :  { %527 = vmatpush3.bf16.msra.mxu0 %v595_v1  ;;  %547 = vmatpush3.bf16.msra.mxu1 %v604_v4  ;;  %v600_v9 = vld [vmem:[#allocation5 + $0x10] sm:$0xff]   ;;  %v607_v10 = vld [vmem:[#allocation7 + $0x20] sm:$0xff]   ;;  %v601_v11 = vld [vmem:[#allocation5 + $0x8] sm:$0xff]   ;;  %p705_p7 = scmp.lt.s32.totalorder %s449_s25, %s449_s25 }
  0x35   :  { %528 = vmatprep.subr.bf16.mxu0 %v734_v0  ;;  %548 = vmatprep.subr.bf16.mxu1 %v734_v0  ;;  %v608_v12 = vld [vmem:[#allocation7 + $0x18] sm:$0xff]   ;;  %v602_v13 = vld [vmem:[#allocation5] sm:$0xff]   ;;  %v609_v15 = vld [vmem:[#allocation7 + $0x10] sm:$0xff]  }
  0x36   :  { %v603_v14 = vld [vmem:[#allocation2] sm:$0xff]   ;;  %v610_v16 = vld [vmem:[#allocation7 + $0x8] sm:$0xff]   ;;  %v611_v17 = vld [vmem:[#allocation7] sm:$0xff]  }
  0x37   :  { %v612_v18 = vld [vmem:[#allocation8 + $0x38] sm:$0xff]   ;;  %v613_v19 = vld [vmem:[#allocation8 + $0x30] sm:$0xff]   ;;  %v614_v20 = vld [vmem:[#allocation8 + $0x28] sm:$0xff]  }
  0x38   :  { %529 = vmatpush3.bf16.msra.mxu0 %v596_v2  ;;  %549 = vmatpush3.bf16.msra.mxu1 %v605_v6  ;;  %v615_v21 = vld [vmem:[#allocation8 + $0x20] sm:$0xff]   ;;  %v616_v22 = vld [vmem:[#allocation8 + $0x18] sm:$0xff]   ;;  %v617_v33 = vld [vmem:[#allocation8 + $0x10] sm:$0xff]  }
  0x39   :  { %530 = vmatprep.subr.bf16.mxu0 %v734_v0  ;;  %550 = vmatprep.subr.bf16.mxu1 %v734_v0  ;;  %v462_v23 = vld [vmem:[%s848_s2] ss:$0 sm:$0xff]  ;;  %v618_v34 = vld [vmem:[#allocation8 + $0x8] sm:$0xff]   ;;  %v619_v35 = vld [vmem:[#allocation8] sm:$0xff]  }
  0x3a   :  { %v472_v36 = vld [vmem:[%s850_s4] ss:$0 sm:$0xff]  ;;  %s700_s4 = scalar_lea.vmem %s449_s25, 128 }
  0x3b   :  { %v481_v47 = vld [vmem:[%s852_s6] ss:$0 sm:$0xff]  ;;  %p701_p6 = scmp.ne.s32.totalorder %s449_s25, %s700_s4  ;;  %p706_p8 = scmp.lt.s32.totalorder %s700_s4, %s700_s4 }
  0x3c   :  { %531 = vmatpush3.bf16.msra.mxu0 %v597_v3  ;;  %551 = vmatpush3.bf16.msra.mxu1 %v606_v8 }
  0x3d   :  { %532 = vmatprep.subr.bf16.mxu0 %v734_v0  ;;  %552 = vmatprep.subr.bf16.mxu1 %v734_v0  ;;  %p707_p9 = por %p706_p8, %p705_p7 }
  0x3f   :  { %p708_p10 = pnand %p707_p9, %p701_p6 }
  0x40   :  { %533 = vmatpush3.bf16.msra.mxu0 %v598_v5  ;;  %553 = vmatpush3.bf16.msra.mxu1 %v607_v10 }
  0x41   :  { %534 = vmatprep.subr.bf16.mxu0 %v734_v0  ;;  %554 = vmatprep.subr.bf16.mxu1 %v734_v0 }
  0x44   :  { %535 = vmatpush3.bf16.msra.mxu0 %v599_v7  ;;  %555 = vmatpush3.bf16.msra.mxu1 %v608_v12 }
  0x45   :  { %536 = vmatprep.subr.bf16.mxu0 %v734_v0  ;;  %556 = vmatprep.subr.bf16.mxu1 %v734_v0 }
  0x48   :  { %537 = vmatpush3.bf16.msra.mxu0 %v600_v9  ;;  %557 = vmatpush3.bf16.msra.mxu1 %v609_v15 }
  0x49   :  { %538 = vmatprep.subr.bf16.mxu0 %v734_v0  ;;  %558 = vmatprep.subr.bf16.mxu1 %v734_v0 }
  0x4c   :  { %539 = vmatpush3.bf16.msra.mxu0 %v601_v11  ;;  %559 = vmatpush3.bf16.msra.mxu1 %v610_v16 }
  0x4d   :  { %540 = vmatprep.subr.bf16.mxu0 %v734_v0  ;;  %560 = vmatprep.subr.bf16.mxu1 %v734_v0 }
  0x50   :  { %541 = vmatpush3.bf16.msra.mxu0 %v602_v13  ;;  %561 = vmatpush3.bf16.msra.mxu1 %v611_v17 }
  0x51   :  { %566 = vmatprep.subr.bf16.mxu0 %v734_v0 }
  0x53   :  { %543 = vmatmul.mubr.bf16.vlgmr.msra.gmra.mxu0 %v603_v14 }
  0x54   :  { %582 = vmatprep.mubr.msk.bf16.mxu0 %vm735_vm0, %v734_v0  ;;  %567 = vmatpush3.bf16.msra.mxu0 %v612_v18 }
  0x55   :  { %568 = vmatprep.subr.bf16.mxu0 %v734_v0 }
  0x58   :  { %569 = vmatpush3.bf16.msra.mxu0 %v613_v19 }
  0x59   :  { %570 = vmatprep.subr.bf16.mxu0 %v734_v0 }
  0x5c   :  { %571 = vmatpush3.bf16.msra.mxu0 %v614_v20 }
  0x5d   :  { %572 = vmatprep.subr.bf16.mxu0 %v734_v0 }
  0x60   :  { %573 = vmatpush3.bf16.msra.mxu0 %v615_v21 }
  0x61   :  { %574 = vmatprep.subr.bf16.mxu0 %v734_v0 }
  0x64   :  { %575 = vmatpush3.bf16.msra.mxu0 %v616_v22 }
  0x65   :  { %576 = vmatprep.subr.bf16.mxu0 %v734_v0 }
  0x68   :  { %577 = vmatpush3.bf16.msra.mxu0 %v617_v33 }
  0x69   :  { %578 = vmatprep.subr.bf16.mxu0 %v734_v0 }
  0x6c   :  { %579 = vmatpush3.bf16.msra.mxu0 %v618_v34 }
  0x6d   :  { %580 = vmatprep.subr.bf16.mxu0 %v734_v0 }
  0x70   :  { %581 = vmatpush3.bf16.msra.mxu0 %v619_v35 }
 0x113   :  { %v196_v24 = vpop.f32.mrf.mxu0 }
 0x114   :  { %v197_v26 = vadd.f32 %v462_v23, %v196_v24 }
 0x115   :  { %v544_v25 = vpop.f32.mrf.mxu0 }
 0x116   :  { %v203_v30 = vmax.f32 %v197_v26, 0.0 }
 0x117   :  { %v199_v27 = vpop.f32.mrf.mxu0 }
 0x118   :  { %v200_v28 = vadd.f32 %v462_v23, %v199_v27 }
 0x119   :  { %v545_v29 = vpop.f32.mrf.mxu0 }
 0x11a   :  { %v204_v31 = vmax.f32 %v200_v28, 0.0 }
 0x11c   :  { %v205_v32 = vpack.c.bf16 %v204_v31, %v203_v30 }
 0x11e   :  { %563 = vmatmul.mubr.bf16.vlgmr.msra.gmra.mxu1 %v205_v32 }
 0x1de   :  { %v311_v37 = vpop.f32.mrf.mxu1 }
 0x1df   :  { %v312_v39 = vadd.f32 %v472_v36, %v311_v37 }
 0x1e0   :  { %v564_v38 = vpop.f32.mrf.mxu1 }
 0x1e1   :  { %v318_v43 = vmax.f32 %v312_v39, 0.0 }
 0x1e2   :  { %v314_v40 = vpop.f32.mrf.mxu1 }
 0x1e3   :  { %v315_v41 = vadd.f32 %v472_v36, %v314_v40 }
 0x1e4   :  { %v565_v42 = vpop.f32.mrf.mxu1 }
 0x1e5   :  { %v319_v44 = vmax.f32 %v315_v41, 0.0 }
 0x1e7   :  { %v320_v45 = vpack.c.bf16 %v319_v44, %v318_v43 }
 0x1e9   :  { %583 = vmatmul.mubr.bf16.vlgmr.msra.gmra.mxu0 %v320_v45 }
 0x2a9   :  { %v426_v46 = vpop.f32.mrf.mxu0 }
 0x2aa   :  { %v427_v50 = vadd.f32 %v481_v47, %v426_v46 }
 0x2ab   :  { %v584_v48 = vpop.f32.mrf.mxu0 }
 0x2ad   :  { %v429_v49 = vpop.f32.mrf.mxu0 }
 0x2ae   :  { %v430_v51 = vadd.f32 %v481_v47, %v429_v49 }
 0x2af   :  { %v585_v52 = vpop.f32.mrf.mxu0 }
 0x2b0   :  { %v497_v53 = vpack.c.bf16 %v430_v51, %v427_v50 }
 0x2b2   :  { %498 = vst [vmem:[#allocation10] sm:$0xff] %v497_v53  }
 0x2b3   :  { %711 = shalt.err (!%p708_p10)
}
 0x2b4   :  { %454 = dma.vmem_to_hbm [thread:$0]  %s449_s25, 128, %s853_s7, [#allocation4], %s730_s29, %s730_s29, %s731_s30  }
 0x2b5   :  { %726 = dma.done.wait [#allocation4], 128  }
 0x2b6   :  { %727 = vsyncadd [#allocation4], 4294967168 }
 0x2b7   :  { %458 = vsyncpa [#allocation3], 1 }
 0x2b8   :  { %459 = vsyncpa [#allocation6], 1 }
 0x2b9   :  { %460 = vsyncpa [#allocation9], 1 }
 0x2ba   :  { %461 = vsyncpa [#allocation4], 1 }

</bundles_post_ra>
